<compile_context>
chip_gen: v6e
topology: v6e:2x2x1
jax: 0.10.0
libtpu: 0.0.40
codegen_flags: <defaults>
</compile_context>

<pallas_src>
import functools

import jax
import jax.numpy as jnp
import numpy as np
from jax.experimental import pallas as pl
from jax.experimental.pallas import tpu as pltpu

_LANE = 128
_SMOOTH = 1e-05


def _round_up(x, m):
    return -(-x // m) * m


def _cdiv(a, b):
    return -(-a // b)


def _pick_tiling(rows, n_classes, itemsize, fuse_softmax):
    """Pick (tile_rows, vmem_limit_bytes); generation-aware VMEM budget."""
    try:
        vmem_bytes = int(pltpu.get_tpu_info().vmem_capacity_bytes)
    except Exception:
        vmem_bytes = 64 * 1024 * 1024            # conservative (v7x-sized) fallback
    if vmem_bytes >= 128 * 1024 * 1024:          # v5e / v6e
        budget = 12 * 1024 * 1024
        vmem_limit = 64 * 1024 * 1024
    else:                                        # v7x (64 MiB physical per TC)
        budget = 6 * 1024 * 1024
        vmem_limit = 32 * 1024 * 1024

    # Bytes of working set per pixel-row (128 px): model-dtype score tile plus the
    # fused-softmax f32 temporaries (s_all / e) plus <= 4 B of labels.
    per_row = _LANE * (n_classes * (itemsize + (8 if fuse_softmax else 0)) + 4)
    cap = (budget // per_row) // 32 * 32
    cap = max(32, min(2048, cap))

    if rows <= cap:
        # Single tile.  Tiny / misaligned inputs get a cheap zero round-up to the
        # dtype-safe sublane multiple; otherwise use the rows exactly (block ==
        # full-array-dim) so the score tensor is never copied.
        sub = {4: 8, 2: 16, 1: 32}.get(itemsize, 8)
        if rows % sub == 0 or rows >= 1024:
            return rows, vmem_limit
        return _round_up(rows, sub), vmem_limit

    # Multi-tile: prefer a 32-multiple tile size that divides rows exactly
    # (no ragged tail -> no in-kernel masking), else fall back to `cap`.
    lo = max(32, (cap // 2) // 32 * 32)
    for tr in range(cap, lo - 1, -32):
        if rows % tr == 0:
            return tr, vmem_limit
    return cap, vmem_limit


def _dice_sums_kernel(score_ref, labels_ref, out_ref,
                      inter_acc, y_acc, z_acc,
                      *, n_classes, fuse_softmax, mask_tail):
    # score_ref : (C, TR, 128)  model dtype   (one pixel tile, all classes)
    # labels_ref: (TR, 128)     int8/int32    (integer labels, -1 = padding)
    # out_ref   : (C, 3)        f32           (per (n, shard) partial sums)
    # *_acc     : (C, 128)      f32           lane-wise accumulators (VMEM scratch)
    t = pl.program_id(2)

    @pl.when(t == 0)
    def _init():
        inter_acc[...] = jnp.zeros_like(inter_acc)
        y_acc[...] = jnp.zeros_like(y_acc)
        z_acc[...] = jnp.zeros_like(z_acc)

    labels = labels_ref[...].astype(jnp.int32)               # (TR, 128)
    valid = (labels >= 0) if mask_tail else None             # -1 marks padding

    if fuse_softmax:
        s_all = score_ref[...].astype(jnp.float32)           # (C, TR, 128)
        m = jnp.max(s_all, axis=0, keepdims=True)
        e = jnp.exp(s_all - m)                                # EUP
        # approx=True (~2^-12 rel. error) would not hold the 1e-5 reference
        # check, so keep the exact reciprocal; still one div + C multiplies.
        inv_d = pl.reciprocal(jnp.sum(e, axis=0, keepdims=True), approx=False)

    for c in range(n_classes):
        if fuse_softmax:
            sc = e[c] * inv_d[0]                              # (TR, 128) f32
        else:
            sc = score_ref[c].astype(jnp.float32)             # (TR, 128) f32
        if mask_tail:
            # Select (not multiply): also squashes NaN/garbage in OOB tails.
            sc = jnp.where(valid, sc, 0.0)
        onehot = labels == c
        inter_acc[c:c + 1, :] += jnp.sum(jnp.where(onehot, sc, 0.0),
                                         axis=0, keepdims=True)
        y_acc[c:c + 1, :] += jnp.sum(jnp.where(onehot, 1.0, 0.0),
                                     axis=0, keepdims=True)
        z_acc[c:c + 1, :] += jnp.sum(sc * sc, axis=0, keepdims=True)

    @pl.when(t == pl.num_programs(2) - 1)
    def _finalize():
        # Single cross-lane reduce + one tiny store per (batch, shard).
        out_ref[...] = jnp.concatenate(
            [jnp.sum(inter_acc[...], axis=1, keepdims=True),
             jnp.sum(y_acc[...], axis=1, keepdims=True),
             jnp.sum(z_acc[...], axis=1, keepdims=True)], axis=1)      # (C, 3)


def dice_loss(inputs, target, weight=None, softmax=False):
    """inputs: (N, C, H, W) scores (float dtype); target: (N, H, W) int labels."""
    N, C, H, W = inputs.shape
    HW = H * W
    rows = _cdiv(HW, _LANE)
    itemsize = jnp.dtype(inputs.dtype).itemsize
    tile_rows, vmem_limit = _pick_tiling(rows, C, itemsize, bool(softmax))

    num_tiles = _cdiv(rows, tile_rows)
    # v7x megacore: when the batch axis alone cannot balance the two TensorCores
    # (N odd, typically N == 1), split the pixel tiles 2-way.  A size-1 shard
    # axis (and single-core v5e/v6e) is a harmless no-op.
    n_shards = 2 if (N % 2 == 1 and num_tiles >= 2) else 1
    tiles_per_shard = _cdiv(num_tiles, n_shards)
    covered_rows = n_shards * tiles_per_shard * tile_rows

    # Labels are cheap: pad them with the -1 sentinel up to the full covered
    # extent so every OOB / phantom / lane-pad pixel is masked in-kernel.
    label_dtype = jnp.int8 if (C <= 127 and tile_rows % 32 == 0) else jnp.int32
    labels = target.reshape(N, HW).astype(label_dtype)
    lbl_pad = covered_rows * _LANE - HW
    if lbl_pad:
        labels = jnp.pad(labels, ((0, 0), (0, lbl_pad)), constant_values=-1)
    labels = labels.reshape(N, covered_rows, _LANE)

    # Scores are NOT padded along the tile axis (ragged last tile is masked via
    # labels < 0).  Only two cheap cases still copy: a lane pad (HW % 128 != 0)
    # and a tiny-input sublane round-up.
    # TODO(synk): the HW % 128 lane pad could also be avoided by feeding the flat
    # (N, C, HW) array with 128-multiple lane blocks and relaying out in-kernel.
    score_rows = max(rows, tile_rows)     # > rows only for the tiny single-tile case
    score = inputs.reshape(N, C, HW)
    pad_px = score_rows * _LANE - HW
    if pad_px:
        score = jnp.pad(score, ((0, 0), (0, 0), (0, pad_px)))
    score = score.reshape(N, C, score_rows, _LANE)

    mask_tail = covered_rows * _LANE != HW

    kernel = functools.partial(_dice_sums_kernel, n_classes=C,
                               fuse_softmax=bool(softmax), mask_tail=mask_tail)

    max_tile = num_tiles - 1

    def score_map(n, s, t):
        # Clamp so a phantom shard tile re-reads the last real tile (its labels
        # are all -1, so it contributes nothing) instead of running off the array.
        return (n, 0, jnp.minimum(s * tiles_per_shard + t, max_tile), 0)

    def label_map(n, s, t):
        return (n, s * tiles_per_shard + t, 0)

    def out_map(n, s, t):
        return (n, s, 0, 0)

    sums = pl.pallas_call(
        kernel,
        out_shape=jax.ShapeDtypeStruct((N, n_shards, C, 3), jnp.float32),
        grid_spec=pltpu.PrefetchScalarGridSpec(
            num_scalar_prefetch=0,
            grid=(N, n_shards, tiles_per_shard),
            in_specs=[
                pl.BlockSpec((None, C, tile_rows, _LANE), score_map),
                pl.BlockSpec((None, tile_rows, _LANE), label_map),
            ],
            out_specs=pl.BlockSpec((None, None, C, 3), out_map),
            scratch_shapes=[pltpu.VMEM((C, _LANE), jnp.float32)] * 3,
        ),
        compiler_params=pltpu.CompilerParams(
            dimension_semantics=("parallel", "parallel", "arbitrary"),
            vmem_limit_bytes=vmem_limit,
        ),
    )(score, labels)

    if weight is None:
        weight = [1.0] * C
    w = jnp.asarray(weight, dtype=jnp.float32)

    totals = jnp.sum(sums, axis=(0, 1))              # (C, 3): combine partials
    intersect = totals[:, 0]
    y_sum = totals[:, 1]
    z_sum = totals[:, 2]
    dice = 1.0 - (2.0 * intersect + _SMOOTH) / (z_sum + y_sum + _SMOOTH)
    return jnp.sum(dice * w) / C


def _reference_dice_loss(inputs, target, n_classes, weight=None, softmax=False):
    # Pure numpy (float64) reference mirroring the PyTorch module.
    x = np.asarray(inputs, dtype=np.float64)
    t = np.asarray(target)
    if softmax:
        x = np.exp(x - x.max(axis=1, keepdims=True))
        x = x / x.sum(axis=1, keepdims=True)
    if weight is None:
        weight = [1.0] * n_classes
    smooth = 1e-05
    loss = 0.0
    for i in range(n_classes):
        s = x[:, i]
        m = (t == i).astype(np.float64)
        intersect = np.sum(s * m)
        y_sum = np.sum(m * m)
        z_sum = np.sum(s * s)
        dice = 1.0 - (2.0 * intersect + smooth) / (z_sum + y_sum + smooth)
        loss += dice * weight[i]
    return loss / n_classes


if __name__ == "__main__":
    key = jax.random.PRNGKey(0)
    k_in, k_tgt, k_in2, k_tgt2 = jax.random.split(key, 4)

    # --- Case 1/2: small module-sized input (N=2, C=4, 16x16). ---
    N, C, H, W = 2, 4, 16, 16
    logits = jax.random.normal(k_in, (N, C, H, W), dtype=jnp.float32)
    probs = jax.nn.softmax(logits, axis=1)
    target = jax.random.randint(k_tgt, (N, H, W), 0, C, dtype=jnp.int32)

    # Pre-softmaxed probabilities, softmax=False (module default usage).
    loss1 = jax.block_until_ready(dice_loss(probs, target, weight=None, softmax=False))
    ref1 = _reference_dice_loss(np.array(probs), np.array(target), C)
    assert np.allclose(float(loss1), ref1, rtol=1e-5, atol=1e-5), (float(loss1), ref1)

    # Raw logits with in-kernel fused softmax.
    loss2 = jax.block_until_ready(dice_loss(logits, target, weight=None, softmax=True))
    ref2 = _reference_dice_loss(np.array(logits), np.array(target), C, softmax=True)
    assert np.allclose(float(loss2), ref2, rtol=1e-5, atol=1e-5), (float(loss2), ref2)

    # --- Case 3: batch-1 multi-tile path (pipelined tiles, v7x 2-way tile shard,
    # ragged/phantom masking, int8 labels, per-class weights, fused softmax). ---
    N2, C2, H2, W2 = 1, 3, 768, 768
    logits2 = jax.random.normal(k_in2, (N2, C2, H2, W2), dtype=jnp.float32)
    target2 = jax.random.randint(k_tgt2, (N2, H2, W2), 0, C2, dtype=jnp.int32)
    wts = [1.0, 0.5, 2.0]
    loss3 = jax.block_until_ready(dice_loss(logits2, target2, weight=wts, softmax=True))
    ref3 = _reference_dice_loss(np.array(logits2), np.array(target2), C2,
                                weight=wts, softmax=True)
    assert np.allclose(float(loss3), ref3, rtol=1e-4, atol=1e-5), (float(loss3), ref3)

    print("KERNEL_OK")
</pallas_src>

<mosaic_0001>
module attributes {stable_mosaic.version = 11 : i64} {
  func.func @_dice_sums_kernel(%arg0: i32, %arg1: i32, %arg2: i32, %arg3: memref<1x4x8x128xf32, #tpu.memory_space<vmem>>, %arg4: memref<1x8x128xi32, #tpu.memory_space<vmem>>, %arg5: memref<1x1x4x3xf32, #tpu.memory_space<vmem>>, %arg6: memref<4x128xf32, #tpu.memory_space<vmem>>, %arg7: memref<4x128xf32, #tpu.memory_space<vmem>>, %arg8: memref<4x128xf32, #tpu.memory_space<vmem>>) attributes {dimension_semantics = [#tpu.dimension_semantics<parallel>, #tpu.dimension_semantics<parallel>, #tpu.dimension_semantics<arbitrary>], iteration_bounds = array<i64: 2, 1, 1>, scalar_prefetch = 0 : i64, scratch_operands = 3 : i64, tpu.core_type = #tpu.core_type<tc>, window_params = [{transform_indices = @transform_0, window_bounds = array<i64: 1, 4, 8, 128>}, {transform_indices = @transform_1, window_bounds = array<i64: 1, 8, 128>}, {transform_indices = @transform_2, window_bounds = array<i64: 1, 1, 4, 3>}]} {
    %c0_i32 = arith.constant 0 : i32
    %0 = arith.cmpi eq, %arg2, %c0_i32 : i32
    %1 = arith.extui %0 : i1 to i32
    %c0_i32_0 = arith.constant 0 : i32
    %2 = arith.cmpi ne, %1, %c0_i32_0 : i32
    scf.if %2 {
      %cst_95 = arith.constant 0.000000e+00 : f32
      %118 = vector.broadcast %cst_95 : f32 to vector<4x128xf32>
      %c0_96 = arith.constant 0 : index
      %c0_97 = arith.constant 0 : index
      %119 = vector.load %arg6[%c0_96, %c0_97] : memref<4x128xf32, #tpu.memory_space<vmem>>, vector<4x128xf32>
      tpu.vector_store %arg6[%c0_96, %c0_97], %118 {strides = array<i32>} : memref<4x128xf32, #tpu.memory_space<vmem>>, vector<4x128xf32>,
      %cst_98 = arith.constant 0.000000e+00 : f32
      %120 = vector.broadcast %cst_98 : f32 to vector<4x128xf32>
      %c0_99 = arith.constant 0 : index
      %c0_100 = arith.constant 0 : index
      %121 = vector.load %arg7[%c0_99, %c0_100] : memref<4x128xf32, #tpu.memory_space<vmem>>, vector<4x128xf32>
      tpu.vector_store %arg7[%c0_99, %c0_100], %120 {strides = array<i32>} : memref<4x128xf32, #tpu.memory_space<vmem>>, vector<4x128xf32>,
      %cst_101 = arith.constant 0.000000e+00 : f32
      %122 = vector.broadcast %cst_101 : f32 to vector<4x128xf32>
      %c0_102 = arith.constant 0 : index
      %c0_103 = arith.constant 0 : index
      %123 = vector.load %arg8[%c0_102, %c0_103] : memref<4x128xf32, #tpu.memory_space<vmem>>, vector<4x128xf32>
      tpu.vector_store %arg8[%c0_102, %c0_103], %122 {strides = array<i32>} : memref<4x128xf32, #tpu.memory_space<vmem>>, vector<4x128xf32>,
    } else {
    }
    %c0 = arith.constant 0 : index
    %c0_1 = arith.constant 0 : index
    %c0_2 = arith.constant 0 : index
    %3 = vector.load %arg4[%c0, %c0_1, %c0_2] : memref<1x8x128xi32, #tpu.memory_space<vmem>>, vector<1x8x128xi32>
    %4 = vector.shape_cast %3 : vector<1x8x128xi32> to vector<8x128xi32>
    %c0_i32_3 = arith.constant 0 : i32
    %5 = vector.broadcast %c0_i32_3 : i32 to vector<8x128xi32>
    %6 = arith.cmpi sge, %4, %5 : vector<8x128xi32>
    %c0_4 = arith.constant 0 : index
    %c0_5 = arith.constant 0 : index
    %c0_6 = arith.constant 0 : index
    %c0_7 = arith.constant 0 : index
    %7 = vector.load %arg3[%c0_4, %c0_5, %c0_6, %c0_7] : memref<1x4x8x128xf32, #tpu.memory_space<vmem>>, vector<1x1x8x128xf32>
    %8 = vector.shape_cast %7 : vector<1x1x8x128xf32> to vector<8x128xf32>
    %cst = arith.constant 0.000000e+00 : f32
    %9 = vector.broadcast %cst : f32 to vector<8x128xf32>
    %10 = arith.select %6, %8, %9 : vector<8x128xi1>, vector<8x128xf32>
    %c0_i32_8 = arith.constant 0 : i32
    %11 = vector.broadcast %c0_i32_8 : i32 to vector<8x128xi32>
    %12 = arith.cmpi eq, %4, %11 : vector<8x128xi32>
    %c0_9 = arith.constant 0 : index
    %c0_10 = arith.constant 0 : index
    %13 = vector.load %arg6[%c0_9, %c0_10] : memref<4x128xf32, #tpu.memory_space<vmem>>, vector<1x128xf32>
    %cst_11 = arith.constant 0.000000e+00 : f32
    %14 = vector.broadcast %cst_11 : f32 to vector<8x128xf32>
    %15 = arith.select %12, %10, %14 : vector<8x128xi1>, vector<8x128xf32>
    %cst_12 = arith.constant dense<0.000000e+00> : vector<128xf32>
    %16 = vector.multi_reduction <add>, %15, %cst_12 [0] : vector<8x128xf32> to vector<128xf32>
    %17 = vector.shape_cast %16 : vector<128xf32> to vector<1x128xf32>
    %18 = arith.addf %13, %17 : vector<1x128xf32>
    %c0_13 = arith.constant 0 : index
    %c0_14 = arith.constant 0 : index
    %19 = vector.load %arg6[%c0_13, %c0_14] : memref<4x128xf32, #tpu.memory_space<vmem>>, vector<1x128xf32>
    tpu.vector_store %arg6[%c0_13, %c0_14], %18 {strides = array<i32>} : memref<4x128xf32, #tpu.memory_space<vmem>>, vector<1x128xf32>,
    %c0_15 = arith.constant 0 : index
    %c0_16 = arith.constant 0 : index
    %20 = vector.load %arg7[%c0_15, %c0_16] : memref<4x128xf32, #tpu.memory_space<vmem>>, vector<1x128xf32>
    %cst_17 = arith.constant 1.000000e+00 : f32
    %cst_18 = arith.constant 0.000000e+00 : f32
    %21 = vector.broadcast %cst_17 : f32 to vector<8x128xf32>
    %22 = vector.broadcast %cst_18 : f32 to vector<8x128xf32>
    %23 = arith.select %12, %21, %22 : vector<8x128xi1>, vector<8x128xf32>
    %cst_19 = arith.constant dense<0.000000e+00> : vector<128xf32>
    %24 = vector.multi_reduction <add>, %23, %cst_19 [0] : vector<8x128xf32> to vector<128xf32>
    %25 = vector.shape_cast %24 : vector<128xf32> to vector<1x128xf32>
    %26 = arith.addf %20, %25 : vector<1x128xf32>
    %c0_20 = arith.constant 0 : index
    %c0_21 = arith.constant 0 : index
    %27 = vector.load %arg7[%c0_20, %c0_21] : memref<4x128xf32, #tpu.memory_space<vmem>>, vector<1x128xf32>
    tpu.vector_store %arg7[%c0_20, %c0_21], %26 {strides = array<i32>} : memref<4x128xf32, #tpu.memory_space<vmem>>, vector<1x128xf32>,
    %c0_22 = arith.constant 0 : index
    %c0_23 = arith.constant 0 : index
    %28 = vector.load %arg8[%c0_22, %c0_23] : memref<4x128xf32, #tpu.memory_space<vmem>>, vector<1x128xf32>
    %29 = arith.mulf %10, %10 : vector<8x128xf32>
    %cst_24 = arith.constant dense<0.000000e+00> : vector<128xf32>
    %30 = vector.multi_reduction <add>, %29, %cst_24 [0] : vector<8x128xf32> to vector<128xf32>
    %31 = vector.shape_cast %30 : vector<128xf32> to vector<1x128xf32>
    %32 = arith.addf %28, %31 : vector<1x128xf32>
    %c0_25 = arith.constant 0 : index
    %c0_26 = arith.constant 0 : index
    %33 = vector.load %arg8[%c0_25, %c0_26] : memref<4x128xf32, #tpu.memory_space<vmem>>, vector<1x128xf32>
    tpu.vector_store %arg8[%c0_25, %c0_26], %32 {strides = array<i32>} : memref<4x128xf32, #tpu.memory_space<vmem>>, vector<1x128xf32>,
    %c0_27 = arith.constant 0 : index
    %c1 = arith.constant 1 : index
    %c0_28 = arith.constant 0 : index
    %c0_29 = arith.constant 0 : index
    %34 = vector.load %arg3[%c0_27, %c1, %c0_28, %c0_29] : memref<1x4x8x128xf32, #tpu.memory_space<vmem>>, vector<1x1x8x128xf32>
    %35 = vector.shape_cast %34 : vector<1x1x8x128xf32> to vector<8x128xf32>
    %cst_30 = arith.constant 0.000000e+00 : f32
    %36 = vector.broadcast %cst_30 : f32 to vector<8x128xf32>
    %37 = arith.select %6, %35, %36 : vector<8x128xi1>, vector<8x128xf32>
    %c1_i32 = arith.constant 1 : i32
    %38 = vector.broadcast %c1_i32 : i32 to vector<8x128xi32>
    %39 = arith.cmpi eq, %4, %38 : vector<8x128xi32>
    %c1_31 = arith.constant 1 : index
    %c0_32 = arith.constant 0 : index
    %40 = vector.load %arg6[%c1_31, %c0_32] : memref<4x128xf32, #tpu.memory_space<vmem>>, vector<1x128xf32>
    %cst_33 = arith.constant 0.000000e+00 : f32
    %41 = vector.broadcast %cst_33 : f32 to vector<8x128xf32>
    %42 = arith.select %39, %37, %41 : vector<8x128xi1>, vector<8x128xf32>
    %cst_34 = arith.constant dense<0.000000e+00> : vector<128xf32>
    %43 = vector.multi_reduction <add>, %42, %cst_34 [0] : vector<8x128xf32> to vector<128xf32>
    %44 = vector.shape_cast %43 : vector<128xf32> to vector<1x128xf32>
    %45 = arith.addf %40, %44 : vector<1x128xf32>
    %c1_35 = arith.constant 1 : index
    %c0_36 = arith.constant 0 : index
    %46 = vector.load %arg6[%c1_35, %c0_36] : memref<4x128xf32, #tpu.memory_space<vmem>>, vector<1x128xf32>
    tpu.vector_store %arg6[%c1_35, %c0_36], %45 {strides = array<i32>} : memref<4x128xf32, #tpu.memory_space<vmem>>, vector<1x128xf32>,
    %c1_37 = arith.constant 1 : index
    %c0_38 = arith.constant 0 : index
    %47 = vector.load %arg7[%c1_37, %c0_38] : memref<4x128xf32, #tpu.memory_space<vmem>>, vector<1x128xf32>
    %cst_39 = arith.constant 1.000000e+00 : f32
    %cst_40 = arith.constant 0.000000e+00 : f32
    %48 = vector.broadcast %cst_39 : f32 to vector<8x128xf32>
    %49 = vector.broadcast %cst_40 : f32 to vector<8x128xf32>
    %50 = arith.select %39, %48, %49 : vector<8x128xi1>, vector<8x128xf32>
    %cst_41 = arith.constant dense<0.000000e+00> : vector<128xf32>
    %51 = vector.multi_reduction <add>, %50, %cst_41 [0] : vector<8x128xf32> to vector<128xf32>
    %52 = vector.shape_cast %51 : vector<128xf32> to vector<1x128xf32>
    %53 = arith.addf %47, %52 : vector<1x128xf32>
    %c1_42 = arith.constant 1 : index
    %c0_43 = arith.constant 0 : index
    %54 = vector.load %arg7[%c1_42, %c0_43] : memref<4x128xf32, #tpu.memory_space<vmem>>, vector<1x128xf32>
    tpu.vector_store %arg7[%c1_42, %c0_43], %53 {strides = array<i32>} : memref<4x128xf32, #tpu.memory_space<vmem>>, vector<1x128xf32>,
    %c1_44 = arith.constant 1 : index
    %c0_45 = arith.constant 0 : index
    %55 = vector.load %arg8[%c1_44, %c0_45] : memref<4x128xf32, #tpu.memory_space<vmem>>, vector<1x128xf32>
    %56 = arith.mulf %37, %37 : vector<8x128xf32>
    %cst_46 = arith.constant dense<0.000000e+00> : vector<128xf32>
    %57 = vector.multi_reduction <add>, %56, %cst_46 [0] : vector<8x128xf32> to vector<128xf32>
    %58 = vector.shape_cast %57 : vector<128xf32> to vector<1x128xf32>
    %59 = arith.addf %55, %58 : vector<1x128xf32>
    %c1_47 = arith.constant 1 : index
    %c0_48 = arith.constant 0 : index
    %60 = vector.load %arg8[%c1_47, %c0_48] : memref<4x128xf32, #tpu.memory_space<vmem>>, vector<1x128xf32>
    tpu.vector_store %arg8[%c1_47, %c0_48], %59 {strides = array<i32>} : memref<4x128xf32, #tpu.memory_space<vmem>>, vector<1x128xf32>,
    %c0_49 = arith.constant 0 : index
    %c2 = arith.constant 2 : index
    %c0_50 = arith.constant 0 : index
    %c0_51 = arith.constant 0 : index
    %61 = vector.load %arg3[%c0_49, %c2, %c0_50, %c0_51] : memref<1x4x8x128xf32, #tpu.memory_space<vmem>>, vector<1x1x8x128xf32>
    %62 = vector.shape_cast %61 : vector<1x1x8x128xf32> to vector<8x128xf32>
    %cst_52 = arith.constant 0.000000e+00 : f32
    %63 = vector.broadcast %cst_52 : f32 to vector<8x128xf32>
    %64 = arith.select %6, %62, %63 : vector<8x128xi1>, vector<8x128xf32>
    %c2_i32 = arith.constant 2 : i32
    %65 = vector.broadcast %c2_i32 : i32 to vector<8x128xi32>
    %66 = arith.cmpi eq, %4, %65 : vector<8x128xi32>
    %c2_53 = arith.constant 2 : index
    %c0_54 = arith.constant 0 : index
    %67 = vector.load %arg6[%c2_53, %c0_54] : memref<4x128xf32, #tpu.memory_space<vmem>>, vector<1x128xf32>
    %cst_55 = arith.constant 0.000000e+00 : f32
    %68 = vector.broadcast %cst_55 : f32 to vector<8x128xf32>
    %69 = arith.select %66, %64, %68 : vector<8x128xi1>, vector<8x128xf32>
    %cst_56 = arith.constant dense<0.000000e+00> : vector<128xf32>
    %70 = vector.multi_reduction <add>, %69, %cst_56 [0] : vector<8x128xf32> to vector<128xf32>
    %71 = vector.shape_cast %70 : vector<128xf32> to vector<1x128xf32>
    %72 = arith.addf %67, %71 : vector<1x128xf32>
    %c2_57 = arith.constant 2 : index
    %c0_58 = arith.constant 0 : index
    %73 = vector.load %arg6[%c2_57, %c0_58] : memref<4x128xf32, #tpu.memory_space<vmem>>, vector<1x128xf32>
    tpu.vector_store %arg6[%c2_57, %c0_58], %72 {strides = array<i32>} : memref<4x128xf32, #tpu.memory_space<vmem>>, vector<1x128xf32>,
    %c2_59 = arith.constant 2 : index
    %c0_60 = arith.constant 0 : index
    %74 = vector.load %arg7[%c2_59, %c0_60] : memref<4x128xf32, #tpu.memory_space<vmem>>, vector<1x128xf32>
    %cst_61 = arith.constant 1.000000e+00 : f32
    %cst_62 = arith.constant 0.000000e+00 : f32
    %75 = vector.broadcast %cst_61 : f32 to vector<8x128xf32>
    %76 = vector.broadcast %cst_62 : f32 to vector<8x128xf32>
    %77 = arith.select %66, %75, %76 : vector<8x128xi1>, vector<8x128xf32>
    %cst_63 = arith.constant dense<0.000000e+00> : vector<128xf32>
    %78 = vector.multi_reduction <add>, %77, %cst_63 [0] : vector<8x128xf32> to vector<128xf32>
    %79 = vector.shape_cast %78 : vector<128xf32> to vector<1x128xf32>
    %80 = arith.addf %74, %79 : vector<1x128xf32>
    %c2_64 = arith.constant 2 : index
    %c0_65 = arith.constant 0 : index
    %81 = vector.load %arg7[%c2_64, %c0_65] : memref<4x128xf32, #tpu.memory_space<vmem>>, vector<1x128xf32>
    tpu.vector_store %arg7[%c2_64, %c0_65], %80 {strides = array<i32>} : memref<4x128xf32, #tpu.memory_space<vmem>>, vector<1x128xf32>,
    %c2_66 = arith.constant 2 : index
    %c0_67 = arith.constant 0 : index
    %82 = vector.load %arg8[%c2_66, %c0_67] : memref<4x128xf32, #tpu.memory_space<vmem>>, vector<1x128xf32>
    %83 = arith.mulf %64, %64 : vector<8x128xf32>
    %cst_68 = arith.constant dense<0.000000e+00> : vector<128xf32>
    %84 = vector.multi_reduction <add>, %83, %cst_68 [0] : vector<8x128xf32> to vector<128xf32>
    %85 = vector.shape_cast %84 : vector<128xf32> to vector<1x128xf32>
    %86 = arith.addf %82, %85 : vector<1x128xf32>
    %c2_69 = arith.constant 2 : index
    %c0_70 = arith.constant 0 : index
    %87 = vector.load %arg8[%c2_69, %c0_70] : memref<4x128xf32, #tpu.memory_space<vmem>>, vector<1x128xf32>
    tpu.vector_store %arg8[%c2_69, %c0_70], %86 {strides = array<i32>} : memref<4x128xf32, #tpu.memory_space<vmem>>, vector<1x128xf32>,
    %c0_71 = arith.constant 0 : index
    %c3 = arith.constant 3 : index
    %c0_72 = arith.constant 0 : index
    %c0_73 = arith.constant 0 : index
    %88 = vector.load %arg3[%c0_71, %c3, %c0_72, %c0_73] : memref<1x4x8x128xf32, #tpu.memory_space<vmem>>, vector<1x1x8x128xf32>
    %89 = vector.shape_cast %88 : vector<1x1x8x128xf32> to vector<8x128xf32>
    %cst_74 = arith.constant 0.000000e+00 : f32
    %90 = vector.broadcast %cst_74 : f32 to vector<8x128xf32>
    %91 = arith.select %6, %89, %90 : vector<8x128xi1>, vector<8x128xf32>
    %c3_i32 = arith.constant 3 : i32
    %92 = vector.broadcast %c3_i32 : i32 to vector<8x128xi32>
    %93 = arith.cmpi eq, %4, %92 : vector<8x128xi32>
    %c3_75 = arith.constant 3 : index
    %c0_76 = arith.constant 0 : index
    %94 = vector.load %arg6[%c3_75, %c0_76] : memref<4x128xf32, #tpu.memory_space<vmem>>, vector<1x128xf32>
    %cst_77 = arith.constant 0.000000e+00 : f32
    %95 = vector.broadcast %cst_77 : f32 to vector<8x128xf32>
    %96 = arith.select %93, %91, %95 : vector<8x128xi1>, vector<8x128xf32>
    %cst_78 = arith.constant dense<0.000000e+00> : vector<128xf32>
    %97 = vector.multi_reduction <add>, %96, %cst_78 [0] : vector<8x128xf32> to vector<128xf32>
    %98 = vector.shape_cast %97 : vector<128xf32> to vector<1x128xf32>
    %99 = arith.addf %94, %98 : vector<1x128xf32>
    %c3_79 = arith.constant 3 : index
    %c0_80 = arith.constant 0 : index
    %100 = vector.load %arg6[%c3_79, %c0_80] : memref<4x128xf32, #tpu.memory_space<vmem>>, vector<1x128xf32>
    tpu.vector_store %arg6[%c3_79, %c0_80], %99 {strides = array<i32>} : memref<4x128xf32, #tpu.memory_space<vmem>>, vector<1x128xf32>,
    %c3_81 = arith.constant 3 : index
    %c0_82 = arith.constant 0 : index
    %101 = vector.load %arg7[%c3_81, %c0_82] : memref<4x128xf32, #tpu.memory_space<vmem>>, vector<1x128xf32>
    %cst_83 = arith.constant 1.000000e+00 : f32
    %cst_84 = arith.constant 0.000000e+00 : f32
    %102 = vector.broadcast %cst_83 : f32 to vector<8x128xf32>
    %103 = vector.broadcast %cst_84 : f32 to vector<8x128xf32>
    %104 = arith.select %93, %102, %103 : vector<8x128xi1>, vector<8x128xf32>
    %cst_85 = arith.constant dense<0.000000e+00> : vector<128xf32>
    %105 = vector.multi_reduction <add>, %104, %cst_85 [0] : vector<8x128xf32> to vector<128xf32>
    %106 = vector.shape_cast %105 : vector<128xf32> to vector<1x128xf32>
    %107 = arith.addf %101, %106 : vector<1x128xf32>
    %c3_86 = arith.constant 3 : index
    %c0_87 = arith.constant 0 : index
    %108 = vector.load %arg7[%c3_86, %c0_87] : memref<4x128xf32, #tpu.memory_space<vmem>>, vector<1x128xf32>
    tpu.vector_store %arg7[%c3_86, %c0_87], %107 {strides = array<i32>} : memref<4x128xf32, #tpu.memory_space<vmem>>, vector<1x128xf32>,
    %c3_88 = arith.constant 3 : index
    %c0_89 = arith.constant 0 : index
    %109 = vector.load %arg8[%c3_88, %c0_89] : memref<4x128xf32, #tpu.memory_space<vmem>>, vector<1x128xf32>
    %110 = arith.mulf %91, %91 : vector<8x128xf32>
    %cst_90 = arith.constant dense<0.000000e+00> : vector<128xf32>
    %111 = vector.multi_reduction <add>, %110, %cst_90 [0] : vector<8x128xf32> to vector<128xf32>
    %112 = vector.shape_cast %111 : vector<128xf32> to vector<1x128xf32>
    %113 = arith.addf %109, %112 : vector<1x128xf32>
    %c3_91 = arith.constant 3 : index
    %c0_92 = arith.constant 0 : index
    %114 = vector.load %arg8[%c3_91, %c0_92] : memref<4x128xf32, #tpu.memory_space<vmem>>, vector<1x128xf32>
    tpu.vector_store %arg8[%c3_91, %c0_92], %113 {strides = array<i32>} : memref<4x128xf32, #tpu.memory_space<vmem>>, vector<1x128xf32>,
    %c0_i32_93 = arith.constant 0 : i32
    %115 = arith.cmpi eq, %arg2, %c0_i32_93 : i32
    %116 = arith.extui %115 : i1 to i32
    %c0_i32_94 = arith.constant 0 : i32
    %117 = arith.cmpi ne, %116, %c0_i32_94 : i32
    scf.if %117 {
      %c0_95 = arith.constant 0 : index
      %c0_96 = arith.constant 0 : index
      %118 = vector.load %arg6[%c0_95, %c0_96] : memref<4x128xf32, #tpu.memory_space<vmem>>, vector<4x128xf32>
      %cst_97 = arith.constant dense<0.000000e+00> : vector<4xf32>
      %119 = vector.multi_reduction <add>, %118, %cst_97 [1] : vector<4x128xf32> to vector<4xf32>
      %120 = vector.shape_cast %119 : vector<4xf32> to vector<4x1xf32>
      %c0_98 = arith.constant 0 : index
      %c0_99 = arith.constant 0 : index
      %121 = vector.load %arg7[%c0_98, %c0_99] : memref<4x128xf32, #tpu.memory_space<vmem>>, vector<4x128xf32>
      %cst_100 = arith.constant dense<0.000000e+00> : vector<4xf32>
      %122 = vector.multi_reduction <add>, %121, %cst_100 [1] : vector<4x128xf32> to vector<4xf32>
      %123 = vector.shape_cast %122 : vector<4xf32> to vector<4x1xf32>
      %c0_101 = arith.constant 0 : index
      %c0_102 = arith.constant 0 : index
      %124 = vector.load %arg8[%c0_101, %c0_102] : memref<4x128xf32, #tpu.memory_space<vmem>>, vector<4x128xf32>
      %cst_103 = arith.constant dense<0.000000e+00> : vector<4xf32>
      %125 = vector.multi_reduction <add>, %124, %cst_103 [1] : vector<4x128xf32> to vector<4xf32>
      %126 = vector.shape_cast %125 : vector<4xf32> to vector<4x1xf32>
      %127 = tpu.concatenate %120, %123, %126 in 1 : vector<4x1xf32>, vector<4x1xf32>, vector<4x1xf32> -> vector<4x3xf32>
      %c0_104 = arith.constant 0 : index
      %c0_105 = arith.constant 0 : index
      %c0_106 = arith.constant 0 : index
      %c0_107 = arith.constant 0 : index
      %128 = vector.load %arg5[%c0_104, %c0_105, %c0_106, %c0_107] : memref<1x1x4x3xf32, #tpu.memory_space<vmem>>, vector<1x1x4x3xf32>
      %129 = vector.shape_cast %128 : vector<1x1x4x3xf32> to vector<4x3xf32>
      %130 = vector.shape_cast %127 : vector<4x3xf32> to vector<1x1x4x3xf32>
      tpu.vector_store %arg5[%c0_104, %c0_105, %c0_106, %c0_107], %130 {strides = array<i32>} : memref<1x1x4x3xf32, #tpu.memory_space<vmem>>, vector<1x1x4x3xf32>,
    } else {
    }
    return
  }
  func.func @transform_0(%arg0: i32, %arg1: i32, %arg2: i32) -> (i32, i32, i32, i32) {
    %c1_i32 = arith.constant 1 : i32
    %0 = arith.muli %arg1, %c1_i32 : i32
    %1 = arith.addi %0, %arg2 : i32
    %c0_i32 = arith.constant 0 : i32
    %2 = arith.minsi %1, %c0_i32 : i32
    %c0_i32_0 = arith.constant 0 : i32
    %c0_i32_1 = arith.constant 0 : i32
    %c0_i32_2 = arith.constant 0 : i32
    return %arg0, %c0_i32_0, %2, %c0_i32_1 : i32, i32, i32, i32
  }
  func.func @transform_1(%arg0: i32, %arg1: i32, %arg2: i32) -> (i32, i32, i32) {
    %c1_i32 = arith.constant 1 : i32
    %0 = arith.muli %arg1, %c1_i32 : i32
    %1 = arith.addi %0, %arg2 : i32
    %c0_i32 = arith.constant 0 : i32
    %c0_i32_0 = arith.constant 0 : i32
    return %arg0, %1, %c0_i32 : i32, i32, i32
  }
  func.func @transform_2(%arg0: i32, %arg1: i32, %arg2: i32) -> (i32, i32, i32, i32) {
    %c0_i32 = arith.constant 0 : i32
    %c0_i32_0 = arith.constant 0 : i32
    %c0_i32_1 = arith.constant 0 : i32
    return %arg0, %arg1, %c0_i32, %c0_i32_0 : i32, i32, i32, i32
  }
}

</mosaic_0001>

<bundles_post_ra>
// kernel: tpu_custom_call.1
= control target key start
LH: loop header
LB: loop body
LE: loop exit
PB: predicated region body
PF: predicated region fallthrough
CT: control target
= control target key end

     0   :  { %7 = vsyncpa [#allocation6], 0  ;;  %s897_s0 = inlined_call_operand.hbm [shape: f32[2,4,8,128], index: 0, kind: input, shape index: {}]   ;;  %s898_s1 = inlined_call_operand.hbm [shape: s32[2,8,128], index: 1, kind: input, shape index: {}]   ;;  %s899_s2 = inlined_call_operand.vmem [shape: f32[2,1,4,3], index: 2, kind: output, shape index: {}]  }
   0x1   :  { %9 = vsyncpa [#allocation6 + $0x1], 0 }
   0x2   :  { %10 = vsyncpa [#allocation8], 0 }
   0x3   :  { %12 = vsyncpa [#allocation8 + $0x1], 0  ;;  %s741_s9 = smov 0   ;;  %s743_s10 = smov 0  }
   0x4   :  { %s745_s11 = smov 0   ;;  %s747_s12 = smov 0  }
   0x5   :  { %s749_s13 = smov 0   ;;  %s751_s14 = smov 0  }
   0x6 LB: > { %s527_s15 = sadd.s32 4294967295, %s719_s14   ;;  %s37_s16 = sadd.s32 1, %s715_s13  ;;  %s719_s14 = sphi %s751_s14, %s18_s14   ;;  %s715_s13 = sphi %s749_s13, %s908_s13   ;;  %s711_s12 = sphi %s747_s12, %s907_s12   ;;  %s707_s11 = sphi %s745_s11, %s906_s11   ;;  %s703_s10 = sphi %s743_s10, %s905_s10   ;;  %s699_s9 = sphi %s741_s9, %s904_s9  }
   0x7   : > { %p39_p0 = scmp.ge.s32.totalorder %s37_s16, 2  ;;  %s52_s17 = sadd.s32 1, %s707_s11 }
   0x8   : > { %p59_p1 = scmp.ne.s32.totalorder %s707_s11, %s703_s10  ;;  %p60_p2 = scmp.eq.s32.totalorder %s719_s14, 0 }
   0x9   : > { %s910_s16 = smov (%p39_p0, %s37_s16), 0  ;;  %p65_p4 = scmp.ne.s32.totalorder %s703_s10, %s699_s9 }
   0xa   : > { %p777_p3 = por %p60_p2, %p59_p1  ;;  %s47_s19 = ssub.s32 %s715_s13, %s910_s16 }
   0xb   : > { %p66_p5 = scmp.eq.s32.totalorder %s527_s15, 0  ;;  %p50_p6 = scmp.eq.s32.totalorder %s47_s19, 0 }
   0xc   : > { %p557_p8 = scmp.lt.s32.totalorder %s719_s14, 2  ;;  %s793_s22 = sand.u32 1, %s707_s11  }
   0xd   : > { %p784_p7 = por %p66_p5, %p65_p4  ;;  %s545_s23 = sshll.u32 %s715_s13, 9 }
   0xe   : > { %s790_s21 = scalar_select %p50_p6, %s707_s11, %s52_s17  }
   0xf   : > { %s531_s24 = sshll.u32 %s793_s22, 5  ;;  %s161_s27 = scalar_lea.hbm %s897_s0, %s545_s23 }
  0x10   : > { %s151_s28 = scalar_lea.vmem [#allocation5], %s531_s24  ;;  %p802_p9 = pnand %p557_p8, %p777_p3 }
  0x11   : > { %s162_s29 = sshll.u32 %s151_s28, 4  ;;  %s148_s3 = scalar_lea.sflag [#allocation6], %s793_s22  ;;  %s163_s29 = int_to_ptr.vmem [resolvable:$true] %s162_s29 }
  0x12   : > { %p611_p10 = pneg %p802_p9  ;;  %s622_s4 = scalar_lea.vmem %s163_s29, 512 }
  0x13   : > { %p623_p11 = scmp.ne.s32.totalorder %s163_s29, %s622_s4  ;;  %s721_s5 = smov [#allocation5]  }
  0x14   : > { %s627_s6 = sshll.u32 %s721_s5, 4  ;;  %s628_s6 = int_to_ptr.vmem [resolvable:$false] %s627_s6 }
  0x15   : > { %p625_p12 = pnand %p623_p11, %p611_p10  ;;  %s629_s7 = scalar_lea.vmem %s628_s6, 1024 }
  0x16   : > { %p630_p0 = scmp.lt.s32.totalorder %s163_s29, %s628_s6  ;;  %p631_p1 = scmp.lt.s32.totalorder %s629_s7, %s622_s4 }
  0x17   : > { %p626_p13 = pneg %p625_p12 }
  0x18   : > { %p632_p2 = por %p631_p1, %p630_p0 }
  0x1a   : > { %p633_p3 = pnand %p632_p2, %p626_p13 }
  0x1c   : > { %636 = shalt.err (!%p633_p3)
}
  0x1d   : > { %s722_s8 = smov 128   ;;  %s723_s9 = smov 8  }
  0x1e   : > { %553 = dma.hbm_to_vmem [thread:$0]  (!%p802_p9), %s161_s27, 512, %s163_s29, %s148_s3, %s722_s8, %s722_s8, %s723_s9  }
  0x1f   : > { %p536_p4 = scmp.ge.s32.totalorder %s719_s14, 1  ;;  %p190_p5 = scmp.lt.s32.totalorder %s719_s14, 3 }
  0x20   : > { %s534_s15 = sshll.u32 %s793_s22, 3  ;;  %s535_s18 = sshll.u32 %s715_s13, 7 }
  0x21   : > { %p817_p6 = pnand %p536_p4, %p190_p5  ;;  %s176_s19 = scalar_lea.vmem [#allocation7], %s534_s15 }
  0x22   : > { %s185_s23 = sshll.u32 %s176_s19, 4  ;;  %s183_s26 = scalar_lea.hbm %s898_s1, %s535_s18  ;;  %s186_s23 = int_to_ptr.vmem [resolvable:$true] %s185_s23 }
  0x23   : > { %s173_s28 = scalar_lea.sflag [#allocation8], %s793_s22  ;;  %s650_s4 = scalar_lea.vmem %s186_s23, 128 }
  0x24   : > { %p651_p8 = scmp.ne.s32.totalorder %s186_s23, %s650_s4  ;;  %s724_s27 = smov [#allocation7]  }
  0x25   : > { %s655_s29 = sshll.u32 %s724_s27, 4  ;;  %s656_s29 = int_to_ptr.vmem [resolvable:$false] %s655_s29 }
  0x26   : > { %p653_p11 = pnand %p651_p8, %p611_p10  ;;  %s657_s3 = scalar_lea.vmem %s656_s29, 256 }
  0x27   : > { %p658_p13 = scmp.lt.s32.totalorder %s186_s23, %s656_s29  ;;  %p659_p0 = scmp.lt.s32.totalorder %s657_s3, %s650_s4 }
  0x28   : > { %p654_p12 = pneg %p653_p11 }
  0x29   : > { %p660_p1 = por %p659_p0, %p658_p13 }
  0x2b   : > { %p661_p2 = pnand %p660_p1, %p654_p12 }
  0x2d   : > { %664 = shalt.err (!%p661_p2)
}
  0x2e   : > { %556 = dma.hbm_to_vmem [thread:$0]  (!%p802_p9), %s183_s26, 128, %s186_s23, %s173_s28  }
  0x2f   : > { %194 = sbr.rel (%p817_p6) target bundleno = 241 (0xf1), region = 28  ;;  %s196_s22 = sand.u32 (!%p817_p6), 1, %s703_s10  }
  0x30   : > { %s537_s5 = sshll.u32 (!%p817_p6), %s196_s22, 5  ;;  %s197_s6 = scalar_lea.sflag (!%p817_p6), [#allocation6], %s196_s22 }
  0x31   : > { %s200_s7 = scalar_lea.vmem (!%p817_p6), [#allocation5], %s537_s5 }
  0x34   : > { %690 = dma.done.wait (%p784_p7), %s197_s6, 512  }
  0x35   : > { %692 = vsyncadd (%p784_p7), %s197_s6, 4294966784  ;;  %s538_s8 = sshll.u32 %s196_s22, 3  ;;  %s206_s9 = scalar_lea.sflag [#allocation8], %s196_s22 }
  0x36   : > { %s209_s15 = scalar_lea.vmem [#allocation7], %s538_s8 }
  0x37   : > { %694 = dma.done.wait (%p784_p7), %s206_s9, 128  }
  0x38   : > { %696 = vsyncadd (%p784_p7), %s206_s9, 4294967168  ;;  %v725_v0 = vmov 0.0   ;;  %v255_v1 = vld [vmem:[%s209_s15] sm:$0xff]  ;;  %v541_v4 = vld [vmem:[%s200_s7 + $0x10] sm:$0xff]  ;;  %vm396_vm5 = vcmask 1043456   ;;  %p241_p7 = scmp.lt.s32.totalorder %s711_s12, 1 }
  0x39   : > { %252 = vst [vmem:[#allocation2] sm:$0xf] %v725_v0  ;;  %253 = vst [vmem:[#allocation3] sm:$0xf] %v725_v0  ;;  %v257_v2 = vld [vmem:[%s200_s7] sm:$0xff]  ;;  %v540_v3 = vld [vmem:[%s200_s7 + $0x8] sm:$0xff] }
  0x3a   : > { %254 = vst [vmem:[#allocation4] sm:$0xf] %v725_v0  ;;  %vm256_vm0 = vcmp.ge.s32.totalorder %v255_v1, 0  ;;  %vm259_vm1 = vcmp.eq.s32.totalorder %v255_v1, 0  ;;  %vm293_vm2 = vcmp.eq.s32.totalorder %v255_v1, 1  ;;  %vm327_vm3 = vcmp.eq.s32.totalorder %v255_v1, 2 }
  0x3b   : > { %v258_v5 = vsel %vm256_vm0, %v257_v2, 0.0  ;;  %v292_v6 = vsel %vm256_vm0, %v540_v3, 0.0  ;;  %v326_v7 = vsel %vm256_vm0, %v541_v4, 0.0  ;;  %v542_v11 = vld [vmem:[%s200_s7 + $0x18] sm:$0xff]  ;;  %vm361_vm4 = vcmp.eq.s32.totalorder %v255_v1, 3  ;;  %s912_s12 = smov (!%p241_p7, %s711_s12), 1 }
  0x3c   : > { %v261_v8 = vsel %vm259_vm1, %v258_v5, 0.0  ;;  %v295_v9 = vsel %vm293_vm2, %v292_v6, 0.0  ;;  %v329_v10 = vsel %vm327_vm3, %v326_v7, 0.0  ;;  %v848_v12 = vmul.f32 %v258_v5, %v258_v5  ;;  %s539_s20 = sshll.u32 %s912_s12, 2 }
  0x3d   : > { %v262_v13 = vrot.slane %v261_v8, 4  ;;  %v296_v14 = vrot.slane %v295_v9, 4  ;;  %v330_v15 = vrot.slane %v329_v10, 4  ;;  %v851_v16 = vsel %vm256_vm0, %v542_v11, 0.0  ;;  %s247_s18 = scalar_lea.vmem %s899_s2, %s539_s20 }
  0x3e   : > { %v271_v17 = vsel %vm259_vm1, 1.0, %v725_v0  ;;  %v854_v18 = vmul.f32 %v292_v6, %v292_v6  ;;  %v856_v19 = vmul.f32 %v326_v7, %v326_v7  ;;  %v363_v23 = vsel %vm361_vm4, %v851_v16, 0.0 }
  0x3f   : > { %v263_v20 = vadd.f32 %v262_v13, %v261_v8  ;;  %v297_v21 = vadd.f32 %v296_v14, %v295_v9  ;;  %v331_v22 = vadd.f32 %v330_v15, %v329_v10  ;;  %v364_v24 = vrot.slane %v363_v23, 4 }
  0x40   : > { %v272_v25 = vrot.slane %v271_v17, 4  ;;  %v305_v26 = vsel %vm293_vm2, 1.0, %v725_v0  ;;  %v339_v27 = vsel %vm327_vm3, 1.0, %v725_v0  ;;  %v373_v35 = vsel %vm361_vm4, 1.0, %v725_v0  ;;  %v260_v44 = vld [vmem:[#allocation2] sm:$0x1] }
  0x41   : > { %v264_v28 = vrot.slane %v263_v20, 2  ;;  %v298_v29 = vrot.slane %v297_v21, 2  ;;  %v332_v30 = vrot.slane %v331_v22, 2  ;;  %v306_v31 = vrot.slane %v305_v26, 4  ;;  %v294_v49 = vld [vmem:[#allocation2 + $0x1] sm:$0x1] }
  0x42   : > { %v365_v32 = vadd.f32 %v364_v24, %v363_v23  ;;  %v273_v33 = vadd.f32 %v272_v25, %v271_v17  ;;  %v340_v34 = vrot.slane %v339_v27, 4  ;;  %v374_v43 = vrot.slane %v373_v35, 4  ;;  %v328_v50 = vld [vmem:[#allocation2 + $0x2] sm:$0x1]  ;;  %v362_v2 = vld [vmem:[#allocation2 + $0x3] sm:$0x1] }
  0x43   : > { %v265_v36 = vadd.f32 %v264_v28, %v263_v20  ;;  %v299_v37 = vadd.f32 %v298_v29, %v297_v21  ;;  %v333_v38 = vadd.f32 %v332_v30, %v331_v22  ;;  %v307_v39 = vadd.f32 %v306_v31, %v305_v26  ;;  %v270_v3 = vld [vmem:[#allocation3] sm:$0x1]  ;;  %v304_v7 = vld [vmem:[#allocation3 + $0x1] sm:$0x1]  ;;  %v338_v11 = vld [vmem:[#allocation3 + $0x2] sm:$0x1] }
  0x44   : > { %v366_v40 = vrot.slane %v365_v32, 2  ;;  %v274_v41 = vrot.slane %v273_v33, 2  ;;  %v341_v42 = vadd.f32 %v340_v34, %v339_v27  ;;  %v375_v54 = vadd.f32 %v374_v43, %v373_v35  ;;  %v372_v24 = vld [vmem:[#allocation3 + $0x3] sm:$0x1] }
  0x45   : > { %v266_v45 = vrot.slane %v265_v36, 1  ;;  %v300_v46 = vrot.slane %v299_v37, 1  ;;  %v334_v47 = vrot.slane %v333_v38, 1  ;;  %v308_v48 = vrot.slane %v307_v39, 2 }
  0x46   : > { %v367_v51 = vadd.f32 %v366_v40, %v365_v32  ;;  %v275_v52 = vadd.f32 %v274_v41, %v273_v33  ;;  %v342_v53 = vrot.slane %v341_v42, 2  ;;  %v376_v62 = vrot.slane %v375_v54, 2  ;;  %v314_v41 = vld [vmem:[#allocation4 + $0x1] sm:$0x1] }
  0x47   : > { %v267_v55 = vadd.f32 %v266_v45, %v265_v36  ;;  %v301_v56 = vadd.f32 %v300_v46, %v299_v37  ;;  %v335_v57 = vadd.f32 %v334_v47, %v333_v38  ;;  %v309_v58 = vadd.f32 %v308_v48, %v307_v39 }
  0x48   : > { %v368_v59 = vrot.slane %v367_v51, 1  ;;  %v276_v60 = vrot.slane %v275_v52, 1  ;;  %v343_v61 = vadd.f32 %v342_v53, %v341_v42  ;;  %v377_v9 = vadd.f32 %v376_v62, %v375_v54  ;;  %v348_v42 = vld [vmem:[#allocation4 + $0x2] sm:$0x1]  ;;  %v382_v54 = vld [vmem:[#allocation4 + $0x3] sm:$0x1] }
  0x49   : > { %v268_v63 = vadd.f32 %v267_v55, %v260_v44  ;;  %v302_v0 = vadd.f32 %v301_v56, %v294_v49  ;;  %v336_v1 = vadd.f32 %v335_v57, %v328_v50  ;;  %v310_v4 = vrot.slane %v309_v58, 1 }
  0x4a   : > { %v369_v5 = vadd.f32 %v368_v59, %v367_v51  ;;  %v277_v6 = vadd.f32 %v276_v60, %v275_v52  ;;  %v344_v8 = vrot.slane %v343_v61, 1  ;;  %v282_v13 = vrot.slane %v848_v12, 4 }
  0x4b   : > { %269 = vst [vmem:[#allocation2] sm:$0x1] %v268_v63  ;;  %303 = vst [vmem:[#allocation2 + $0x1] sm:$0x1] %v302_v0  ;;  %v311_v10 = vadd.f32 %v310_v4, %v309_v58  ;;  %v316_v14 = vrot.slane %v854_v18, 4  ;;  %v350_v15 = vrot.slane %v856_v19, 4  ;;  %v383_v30 = vmul.f32 %v851_v16, %v851_v16 }
  0x4c   : > { %337 = vst [vmem:[#allocation2 + $0x2] sm:$0x1] %v336_v1  ;;  %v370_v17 = vadd.f32 %v369_v5, %v362_v2  ;;  %v278_v20 = vadd.f32 %v277_v6, %v270_v3  ;;  %v345_v21 = vadd.f32 %v344_v8, %v343_v61  ;;  %v378_v22 = vrot.slane %v377_v9, 1 }
  0x4d   : > { %v312_v23 = vadd.f32 %v311_v10, %v304_v7  ;;  %v283_v25 = vadd.f32 %v282_v13, %v848_v12  ;;  %v317_v26 = vadd.f32 %v316_v14, %v854_v18  ;;  %v351_v27 = vadd.f32 %v350_v15, %v856_v19  ;;  %v280_v19 = vld [vmem:[#allocation4] sm:$0x1] }
  0x4e   : > { %371 = vst [vmem:[#allocation2 + $0x3] sm:$0x1] %v370_v17  ;;  %279 = vst [vmem:[#allocation3] sm:$0x1] %v278_v20  ;;  %v346_v28 = vadd.f32 %v345_v21, %v338_v11  ;;  %v379_v29 = vadd.f32 %v378_v22, %v377_v9  ;;  %v384_v35 = vrot.slane %v383_v30, 4  ;;  %vm408_vm6 = vcmask 7168  }
  0x4f   : > { %313 = vst [vmem:[#allocation3 + $0x1] sm:$0x1] %v312_v23  ;;  %v284_v31 = vrot.slane %v283_v25, 2  ;;  %v318_v32 = vrot.slane %v317_v26, 2  ;;  %v352_v33 = vrot.slane %v351_v27, 2  ;;  %vm410_vm7 = vcmask 15360  }
  0x50   : > { %347 = vst [vmem:[#allocation3 + $0x2] sm:$0x1] %v346_v28  ;;  %v380_v34 = vadd.f32 %v379_v29, %v372_v24  ;;  %v385_v18 = vadd.f32 %v384_v35, %v383_v30  ;;  %vm412_vm8 = vcmask 19456  }
  0x51   : > { %v285_v36 = vadd.f32 %v284_v31, %v283_v25  ;;  %v319_v12 = vadd.f32 %v318_v32, %v317_v26  ;;  %v353_v37 = vadd.f32 %v352_v33, %v351_v27 }
  0x52   : > { %381 = vst [vmem:[#allocation3 + $0x3] sm:$0x1] %v380_v34  ;;  %v386_v16 = vrot.slane %v385_v18, 2 }
  0x53   : > { %v286_v38 = vrot.slane %v285_v36, 1  ;;  %v320_v39 = vrot.slane %v319_v12, 1  ;;  %v354_v40 = vrot.slane %v353_v37, 1 }
  0x54   : > { %v387_v48 = vadd.f32 %v386_v16, %v385_v18 }
  0x55   : > { %v395_v43 = vld [vmem:[#allocation2] sm:$0xf]  ;;  %v287_v44 = vadd.f32 %v286_v38, %v285_v36  ;;  %v321_v45 = vadd.f32 %v320_v39, %v319_v12  ;;  %v355_v46 = vadd.f32 %v354_v40, %v353_v37 }
  0x56   : > { %v397_v47 = vsel %vm396_vm5, %v395_v43, 0.0  ;;  %v388_v52 = vrot.slane %v387_v48, 1 }
  0x57   : > { %398 = vadd.xlane.f32.xlu0 %v397_v47  ;;  %v288_v49 = vadd.f32 %v287_v44, %v280_v19  ;;  %v322_v50 = vadd.f32 %v321_v45, %v314_v41  ;;  %v356_v51 = vadd.f32 %v355_v46, %v348_v42 }
  0x58   : > { %v389_v56 = vadd.f32 %v388_v52, %v387_v48 }
  0x59   : > { %v400_v53 = vld [vmem:[#allocation3] sm:$0xf]  ;;  %289 = vst [vmem:[#allocation4] sm:$0x1] %v288_v49  ;;  %323 = vst [vmem:[#allocation4 + $0x1] sm:$0x1] %v322_v50 }
  0x5a   : > { %357 = vst [vmem:[#allocation4 + $0x2] sm:$0x1] %v356_v51  ;;  %v401_v55 = vsel %vm396_vm5, %v400_v53, 0.0  ;;  %v390_v57 = vadd.f32 %v389_v56, %v382_v54 }
  0x5b   : > { %402 = vadd.xlane.f32.xlu0 %v401_v55 }
  0x5c   : > { %391 = vst [vmem:[#allocation4 + $0x3] sm:$0x1] %v390_v57 }
  0x63   : > { %v404_v58 = vld [vmem:[#allocation4] sm:$0xf] }
  0x64   : > { %v405_v59 = vsel %vm396_vm5, %v404_v58, 0.0 }
  0x65   : > { %406 = vadd.xlane.f32.xlu1 %v405_v59 }
  0xe0   : > { %v399_v60 = vpop.xlane.xlu0 %398 }
  0xe4   : > { %v403_v61 = vpop.xlane.xlu0 %402 }
  0xe5   : > { %v409_v62 = vsel %vm408_vm6, %v399_v60, %v403_v61 }
  0xee   : > { %v407_v63 = vpop.xlane.xlu1 %406 }
  0xef   : > { %v411_v0 = vsel %vm410_vm7, %v409_v62, %v407_v63 }
  0xf0   : > { %413 = vst.msk [vmem:[%s247_s18] sm:$0xf] %vm412_vm8, %v411_v0 }
  0xf1 PF: > { %s18_s14 = sadd.s32 1, %s719_s14   ;;  %s904_s9 = smov %s703_s10 }
  0xf2   : > { %p15_p9 = scmp.ge.s32.totalorder %s18_s14, 4   ;;  %s905_s10 = smov %s707_s11 }
  0xf3   : > { %s906_s11 = smov %s790_s21  ;;  %s907_s12 = smov %s715_s13 }
  0xf4   : > { %s908_s13 = smov %s910_s16  ;;  %17 = sbr.rel (!%p15_p9) target bundleno = 6 (0x6), region = 92 }
  0xf9   :  { %439 = vsyncpa [#allocation6], 1 }
  0xfa   :  { %441 = vsyncpa [#allocation6 + $0x1], 1 }
  0xfb   :  { %442 = vsyncpa [#allocation8], 1 }
  0xfc   :  { %444 = vsyncpa [#allocation8 + $0x1], 1 }

</bundles_post_ra>
